<compile_context>
chip_gen: v7x
topology: tpu7x:2x2x1
jax: 0.10.0
libtpu: 0.0.40
codegen_flags: <defaults>
</compile_context>

<pallas_src>
import functools

import numpy as np
import jax
import jax.numpy as jnp
from jax.experimental import pallas as pl
from jax.experimental.pallas import tpu as pltpu


def _shuffle_kernel(x_ref, o_ref, *, groups):
    """x_ref/o_ref: (Nb, C, H*W) VMEM tiles.

    Channel shuffle == transpose of the (g, C/g) factorization of the channel
    (sublane) axis; the lane axis (H*W) is untouched, so this is a handful of
    in-VMEM sublane moves regardless of C.
    """
    nb, c, hw = x_ref.shape
    cpg = c // groups
    x = x_ref[...]
    o_ref[...] = x.reshape(nb, groups, cpg, hw).swapaxes(1, 2).reshape(nb, c, hw)


def _pick_batch_block(n, per_image_bytes, target_bytes=2 * 1024 * 1024):
    """Largest divisor Nb of n with Nb*per_image_bytes <= target, keeping >=2 grid steps."""
    best = 1
    for nb in range(1, n + 1):
        if n % nb:
            continue
        if nb * per_image_bytes > target_bytes:
            break  # monotonic in nb
        if n // nb >= 2 or n == 1:  # keep >= 2 steps so v7x megacore can split work
            best = nb
    return best


def channel_shuffle(x, groups):
    """x: (N, C, H, W) NCHW.  Returns the channel-shuffled tensor, same shape."""
    n, c, h, w = x.shape
    g = groups
    assert c % g == 0, "channels must be divisible by groups"
    hw = h * w

    dtype_bytes = jnp.dtype(x.dtype).itemsize
    per_image_bytes = c * hw * dtype_bytes
    nb = _pick_batch_block(n, per_image_bytes)
    block_bytes = nb * per_image_bytes
    grid = (n // nb,)

    params = dict(dimension_semantics=("parallel",))
    # in + out, double-buffered -> ~4x block bytes of VMEM.  Only raise the
    # scoped-VMEM limit when a single image is already large; cap well below
    # v7x's 64 MiB physical VMEM.
    vmem_need = 4 * block_bytes + (1 << 20)
    if vmem_need > (16 << 20):
        params["vmem_limit_bytes"] = min(vmem_need, 48 << 20)

    x2 = x.reshape(n, c, hw)  # free, contiguous reshape
    out2 = pl.pallas_call(
        functools.partial(_shuffle_kernel, groups=g),
        out_shape=jax.ShapeDtypeStruct((n, c, hw), x.dtype),
        grid=grid,
        in_specs=[pl.BlockSpec((nb, c, hw), lambda i: (i, 0, 0))],
        out_specs=pl.BlockSpec((nb, c, hw), lambda i: (i, 0, 0)),
        input_output_aliases={0: 0},
        compiler_params=pltpu.CompilerParams(**params),
    )(x2)
    return out2.reshape(n, c, h, w)


def reference_shuffle(x, groups):
    """Pure-JAX reference mirroring the PyTorch forward."""
    n, c, h, w = x.shape
    g = groups
    return x.reshape(n, g, c // g, h, w).transpose(0, 2, 1, 3, 4).reshape(n, c, h, w)


if __name__ == "__main__":
    # Primary test: shapes implied by the module usage (small, lane-aligned).
    key = jax.random.PRNGKey(0)
    N, C, H, W = 2, 4, 16, 16
    groups = 2
    x = jax.random.normal(key, (N, C, H, W), jnp.float32)

    ref = jax.block_until_ready(reference_shuffle(x, groups))
    out = jax.block_until_ready(channel_shuffle(x, groups))
    assert out.shape == (N, C, H, W), out.shape
    np.testing.assert_array_equal(np.asarray(out), np.asarray(ref))

    # Secondary test: batched blocks (Nb=2), g=4, and H*W=64 (not a multiple
    # of 128) to exercise the masked-store / odd-sublane paths flagged in the
    # correctness review.
    key2 = jax.random.PRNGKey(1)
    N2, C2, H2, W2 = 4, 8, 8, 8
    groups2 = 4
    x2 = jax.random.normal(key2, (N2, C2, H2, W2), jnp.float32)

    ref2 = jax.block_until_ready(reference_shuffle(x2, groups2))
    out2 = jax.block_until_ready(channel_shuffle(x2, groups2))
    np.testing.assert_array_equal(np.asarray(out2), np.asarray(ref2))

    print("KERNEL_OK")
</pallas_src>

<mosaic_0001>
module attributes {stable_mosaic.version = 11 : i64} {
  func.func @_shuffle_kernel(%arg0: i32, %arg1: memref<1x4x256xf32, #tpu.memory_space<vmem>>, %arg2: memref<1x4x256xf32, #tpu.memory_space<vmem>>) attributes {dimension_semantics = [#tpu.dimension_semantics<parallel>], iteration_bounds = array<i64: 2>, scalar_prefetch = 0 : i64, scratch_operands = 0 : i64, tpu.core_type = #tpu.core_type<tc>, window_params = [{transform_indices = @transform_0, window_bounds = array<i64: 1, 4, 256>}, {transform_indices = @transform_1, window_bounds = array<i64: 1, 4, 256>}]} {
    %c0 = arith.constant 0 : index
    %c0_0 = arith.constant 0 : index
    %c0_1 = arith.constant 0 : index
    %0 = vector.load %arg1[%c0, %c0_0, %c0_1] : memref<1x4x256xf32, #tpu.memory_space<vmem>>, vector<1x4x256xf32>
    %1 = vector.shape_cast %0 : vector<1x4x256xf32> to vector<1x2x2x256xf32>
    %2 = tpu.transpose %1, [0, 2, 1, 3] : vector<1x2x2x256xf32> -> vector<1x2x2x256xf32>
    %3 = vector.shape_cast %2 : vector<1x2x2x256xf32> to vector<1x4x256xf32>
    %c0_2 = arith.constant 0 : index
    %c0_3 = arith.constant 0 : index
    %c0_4 = arith.constant 0 : index
    %4 = vector.load %arg2[%c0_2, %c0_3, %c0_4] : memref<1x4x256xf32, #tpu.memory_space<vmem>>, vector<1x4x256xf32>
    tpu.vector_store %arg2[%c0_2, %c0_3, %c0_4], %3 {strides = array<i32>} : memref<1x4x256xf32, #tpu.memory_space<vmem>>, vector<1x4x256xf32>,
    return
  }
  func.func @transform_0(%arg0: i32) -> (i32, i32, i32) {
    %c0_i32 = arith.constant 0 : i32
    %c0_i32_0 = arith.constant 0 : i32
    %c0_i32_1 = arith.constant 0 : i32
    return %arg0, %c0_i32, %c0_i32_0 : i32, i32, i32
  }
  func.func @transform_1(%arg0: i32) -> (i32, i32, i32) {
    %c0_i32 = arith.constant 0 : i32
    %c0_i32_0 = arith.constant 0 : i32
    %c0_i32_1 = arith.constant 0 : i32
    return %arg0, %c0_i32, %c0_i32_0 : i32, i32, i32
  }
}

</mosaic_0001>

<bundles_post_ra>
// kernel: tpu_custom_call.1
= control target key start
LH: loop header
LB: loop body
LE: loop exit
PB: predicated region body
PF: predicated region fallthrough
CT: control target
= control target key end

     0   :  { %6 = vsyncpa [#allocation3], 0  ;;  %s590_s0 = inlined_call_operand.hbm [shape: f32[2,4,256], index: 0, kind: input, shape index: {}, may-alias: {0,1}]   ;;  %s591_s1 = inlined_call_operand.hbm [shape: f32[2,4,256], index: 1, kind: output, shape index: {}, may-alias: {0,1}]  }
   0x1   :  { %8 = vsyncpa [#allocation3 + $0x1], 0 }
   0x2   :  { %9 = vsyncpa [#allocation4], 0 }
   0x3   :  { %11 = vsyncpa [#allocation4 + $0x1], 0  ;;  %s429_s6 = smov 0   ;;  %s431_s7 = smov 0  }
   0x4   :  { %s433_s8 = smov 0   ;;  %s435_s9 = smov 0  }
   0x5 LB: > { %s450_s10 = sadd.s32 4294967295, %s413_s9   ;;  %s251_s11 = sadd.s32 4294967294, %s413_s9   ;;  %s413_s9 = sphi %s435_s9, %s606_s9   ;;  %s409_s8 = sphi %s433_s8, %s605_s8   ;;  %s405_s7 = sphi %s431_s7, %s604_s7   ;;  %s401_s6 = sphi %s429_s6, %s603_s6  }
   0x6   : > { %s454_s12 = sadd.s32 1, %s413_s9   ;;  %s24_s13 = sadd.s32 1, %s409_s8 }
   0x7   : > { %s21_s14 = ssub.s32 %s413_s9, %s454_s12  ;;  %p31_p0 = scmp.ne.s32.totalorder %s409_s8, %s405_s7 }
   0x8   : > { %p22_p1 = scmp.eq.s32.totalorder %s21_s14, 0  ;;  %p32_p2 = scmp.eq.s32.totalorder %s413_s9, 0 }
   0x9   : > { %p37_p3 = scmp.ne.s32.totalorder %s405_s7, %s401_s6  ;;  %p38_p4 = scmp.eq.s32.totalorder %s450_s10, 0 }
   0xa   : > { %s466_s15 = scalar_select %p22_p1, %s409_s8, %s24_s13  }
   0xb   : > { %p468_p5 = por %p32_p2, %p31_p0  ;;  %p472_p6 = por %p38_p4, %p37_p3 }
   0xc   : > { %p61_p7 = scmp.eq.s32.totalorder %s450_s10, 1  ;;  %p67_p8 = scmp.eq.s32.totalorder %s251_s11, 1 }
   0xd   : > { %p281_p10 = scmp.lt.s32.totalorder %s413_s9, 2  ;;  %s87_s20 = sand.u32 1, %s409_s8  }
   0xe   : > { %p479_p11 = por %p61_p7, %p31_p0  ;;  %p483_p12 = por %p67_p8, %p37_p3 }
   0xf   : > { %s267_s21 = sshll.u32 %s413_s9, 7  ;;  %s254_s22 = sshll.u32 %s87_s20, 3 }
  0x10   : > { %s595_s18 = scalar_select %p479_p11, 1, 0 }
  0x11   : > { %s596_s19 = scalar_select %p483_p12, 1, 0 }
  0x12   : > { %s492_s25 = scalar_lea.hbm %s590_s0, %s267_s21  ;;  %s91_s26 = scalar_lea.vmem [#allocation2], %s254_s22 }
  0x13   : > { %s99_s27 = sshll.u32 %s91_s26, 4  ;;  %p496_p13 = pnand %p281_p10, %p468_p5  ;;  %s500_s27 = int_to_ptr.vmem [resolvable:$true] %s99_s27 }
  0x14   : > { %s88_s29 = scalar_lea.sflag [#allocation3], %s87_s20  ;;  %s317_s30 = scalar_lea.hbm %s492_s25, 128 }
  0x15   : > { %p318_p2 = scmp.ne.s32.totalorder %s492_s25, %s317_s30  ;;  %p319_p3 = pneg %p496_p13 }
  0x16   : > { %s322_s4 = scalar_lea.hbm %s590_s0, 256  ;;  %p323_p5 = scmp.lt.u32.totalorder %s492_s25, %s590_s0 }
  0x17   : > { %p320_p4 = pnand %p319_p3, %p318_p2  ;;  %p324_p8 = scmp.lt.u32.totalorder %s322_s4, %s317_s30 }
  0x18   : > { %p326_p9 = scmp.lt.u32.totalorder %s317_s30, %s492_s25 }
  0x19   : > { %p321_p7 = pneg %p320_p4  ;;  %p325_p10 = por %p324_p8, %p323_p5 }
  0x1b   : > { %p327_p0 = por %p326_p9, %p325_p10 }
  0x1d   : > { %p328_p1 = pnand %p327_p0, %p321_p7 }
  0x1f   : > { %331 = shalt.err (!%p328_p1)
}
  0x20   : > { %s332_s13 = scalar_lea.vmem %s500_s27, 128  ;;  %s415_s14 = smov [#allocation2]  }
  0x21   : > { %p333_p2 = scmp.ne.s32.totalorder %s500_s27, %s332_s13  ;;  %s337_s16 = sshll.u32 %s415_s14, 4  ;;  %s338_s16 = int_to_ptr.vmem [resolvable:$false] %s337_s16 }
  0x22   : > { %s339_s20 = scalar_lea.vmem %s338_s16, 256  ;;  %p340_p11 = scmp.lt.s32.totalorder %s500_s27, %s338_s16 }
  0x23   : > { %p335_p4 = pnand %p333_p2, %p319_p3  ;;  %p341_p5 = scmp.lt.s32.totalorder %s339_s20, %s332_s13 }
  0x25   : > { %p336_p12 = pneg %p335_p4  ;;  %p342_p8 = por %p341_p5, %p340_p11 }
  0x27   : > { %p343_p9 = pnand %p342_p8, %p336_p12 }
  0x29   : > { %346 = shalt.err (!%p343_p9)
}
  0x2a   : > { %276 = dma.hbm_to_vmem [thread:$0]  (!%p496_p13), %s492_s25, 128, %s500_s27, %s88_s29  }
  0x2b   : > { %p598_p0 = scmp.lt.s32.totalorder %s413_s9, 3  ;;  %p599_p1 = scmp.ge.s32.totalorder %s413_s9, 1 }
  0x2d   : > { %p105_p3 = pnand %p599_p1, %p598_p0 }
  0x2e   : > { %s534_s21 = sand.u32 (!%p105_p3), 1, %s405_s7  }
  0x2f   : > { %108 = sbr.rel (%p105_p3) target bundleno = 82 (0x52), region = 24  ;;  %s258_s22 = sshll.u32 (!%p105_p3), %s534_s21, 3 }
  0x30   : > { %s111_s23 = scalar_lea.sflag (!%p105_p3), [#allocation3], %s534_s21  ;;  %s114_s24 = scalar_lea.vmem (!%p105_p3), [#allocation2], %s258_s22 }
  0x36   : > { %392 = dma.done.wait (%p472_p6), %s111_s23, 128  }
  0x37   : > { %394 = vsyncadd (%p472_p6), %s111_s23, 4294967168  ;;  %v149_v0 = vlaneseq  ;;  %v416_v1 = vmov 1934713408   ;;  %v260_v5 = vld.sshfl [vmem:[%s114_s24] sm:$0xff pattern:$0x76325410] }
  0x38   : > { %v147_v2 = vunpack.c.l.s4 %v416_v1  ;;  %v142_v6 = vcombine.high %v260_v5, %v260_v5  ;;  %s132_s25 = scalar_lea.vmem [#allocation5], %s258_s22  ;;  %s268_s27 = sshll.u32 %s450_s10, 7  ;;  %v417_v10 = vmov 0.0  }
  0x39   : > { %v150_v4 = vshrl.u32 %v149_v0, 7  ;;  %s181_s26 = sshll.u32 %s132_s25, 4  ;;  %s548_s29 = scalar_lea.hbm %s591_s1, %s268_s27  ;;  %s543_s26 = int_to_ptr.vmem [resolvable:$true] %s181_s26 }
  0x3a   : > { %v148_v3 = vunpack.c.0.s8 %v147_v2  ;;  %v145_v8 = vcombine.low %v260_v5, %v142_v6  ;;  %s167_s30 = scalar_lea.sflag [#allocation4], %s534_s21  ;;  %s347_s2 = scalar_lea.vmem %s543_s26, 128 }
  0x3b   : > { %p348_p6 = scmp.ne.s32.totalorder %s543_s26, %s347_s2  ;;  %p600_p11 = scmp.ne.s32.totalorder %s595_s18, 0 }
  0x3c   : > { %v151_v7 = vsub.s32 %v148_v3, %v150_v4  ;;  %s418_s10 = smov [#allocation5]  }
  0x3d   : > { %p349_p12 = pnand %p348_p6, %p600_p11  ;;  %s351_s3 = sshll.u32 %s418_s10, 4  ;;  %s352_s3 = int_to_ptr.vmem [resolvable:$false] %s351_s3 }
  0x3e   : > { %v152_v9 = vrot.slane %v145_v8, %v151_v7  ;;  %s353_s4 = scalar_lea.vmem %s352_s3, 256  ;;  %p354_p7 = scmp.lt.s32.totalorder %s543_s26, %s352_s3 }
  0x3f   : > { %p350_p13 = pneg %p349_p12  ;;  %p355_p10 = scmp.lt.s32.totalorder %s353_s4, %s347_s2 }
  0x40   : > { %v153_v11 = vcombine.high %v152_v9, %v417_v10 }
  0x41   : > { %p356_p2 = por %p355_p10, %p354_p7 }
  0x42   : > { %v156_v12 = vcombine.low %v152_v9, %v153_v11 }
  0x43   : > { %p357_p4 = pnand %p356_p2, %p350_p13 }
  0x44   : > { %261 = vst.sshfl [vmem:[%s132_s25] sm:$0xff pattern:$0x76325410] %v156_v12 }
  0x45   : > { %360 = shalt.err (!%p357_p4)
}
  0x46   : > { %s361_s5 = scalar_lea.hbm %s548_s29, 128  ;;  %s365_s14 = scalar_lea.hbm %s591_s1, 256 }
  0x47   : > { %p362_p5 = scmp.ne.s32.totalorder %s548_s29, %s361_s5  ;;  %p366_p0 = scmp.lt.u32.totalorder %s548_s29, %s591_s1 }
  0x48   : > { %p367_p1 = scmp.lt.u32.totalorder %s365_s14, %s361_s5  ;;  %p369_p6 = scmp.lt.u32.totalorder %s361_s5, %s548_s29 }
  0x49   : > { %p363_p8 = pnand %p362_p5, %p600_p11 }
  0x4a   : > { %p368_p3 = por %p367_p1, %p366_p0 }
  0x4b   : > { %p364_p9 = pneg %p363_p8 }
  0x4c   : > { %p370_p12 = por %p369_p6, %p368_p3 }
  0x4e   : > { %p371_p13 = pnand %p370_p12, %p364_p9 }
  0x50   : > { %374 = shalt.err (!%p371_p13)
}
  0x51   : > { %271 = dma.vmem_to_hbm [thread:$0]  (%p600_p11), %s543_s26, 128, %s548_s29, %s167_s30  }
  0x52 PF: > { %s193_s21 = sand.u32 1, %s401_s6   ;;  %p601_p7 = scmp.ne.s32.totalorder %s596_s19, 0 }
  0x53   : > { %p602_p10 = scmp.ge.s32.totalorder %s413_s9, 2  ;;  %s194_s22 = scalar_lea.sflag [#allocation4], %s193_s21 }
  0x55   : > { %p278_p2 = pnand %p602_p10, %p601_p7 }
  0x57   : > { %396 = dma.done.wait (!%p278_p2), %s194_s22, 128  }
  0x58   : > { %398 = vsyncadd (!%p278_p2), %s194_s22, 4294967168  ;;  %p14_p4 = scmp.ge.s32.totalorder %s454_s12, 4   ;;  %s603_s6 = smov %s405_s7 }
  0x59   : > { %s604_s7 = smov %s409_s8  ;;  %s605_s8 = smov %s466_s15 }
  0x5a   : > { %s606_s9 = smov %s454_s12  ;;  %16 = sbr.rel (!%p14_p4) target bundleno = 5 (0x5), region = 69 }
  0x61   :  { %199 = vsyncpa [#allocation3], 1 }
  0x62   :  { %201 = vsyncpa [#allocation3 + $0x1], 1 }
  0x63   :  { %202 = vsyncpa [#allocation4], 1 }
  0x64   :  { %204 = vsyncpa [#allocation4 + $0x1], 1 }

</bundles_post_ra>
